<compile_context>
chip_gen: v7x
topology: tpu7x:2x2x1
jax: 0.10.0
libtpu: 0.0.40
codegen_flags: <defaults>
</compile_context>

<pallas_src>
import jax
import jax.numpy as jnp
from jax.experimental import pallas as pl
from jax.experimental.pallas import tpu as pltpu


def _round_up(x, m):
    return ((x + m - 1) // m) * m


def _conv1x1_vpu_kernel(x_ref, w_ref, b_ref, o_ref):
    """Small-channel path: out[o, p] = sum_c w[o, c] * x[c, p] + b[o].

    Pure VPU broadcast-MACs (no MXU: a 2x4 @ 4xT matmul pads the systolic array
    to >99% zeros).  x_ref: (1, C, t_pix) VMEM; w_ref: (O*C,) SMEM; b_ref: (O,)
    SMEM; o_ref: (1, O, t_pix) VMEM.
    """
    C = x_ref.shape[1]
    O = o_ref.shape[1]
    x = x_ref[0].astype(jnp.float32)                     # (C, t_pix)
    rows = []
    for o in range(O):
        acc = x[0:1, :] * w_ref[o * C + 0]
        for c in range(1, C):
            acc = acc + x[c:c + 1, :] * w_ref[o * C + c]
        rows.append(acc + b_ref[o])
    o_ref[0] = jnp.concatenate(rows, axis=0).astype(o_ref.dtype)


def _conv1x1_mxu_kernel(x_ref, w_ref, b_ref, o_ref):
    """Large-channel path: W[O, C] @ X[C, t_pix] on the MXU, f32 accumulate."""
    acc = jnp.dot(w_ref[...], x_ref[0], preferred_element_type=jnp.float32)
    o_ref[0] = (acc + b_ref[...]).astype(o_ref.dtype)


def outconv_forward(x_nchw, weight, bias, *, t_pix_target=2048):
    """1x1 conv (the `outconv` module) forward.

    x_nchw : (N, C, H, W)
    weight : (O, C, 1, 1)   -- PyTorch Conv2d weight layout
    bias   : (O,)
    returns (N, O, H, W)
    """
    N, C, H, W = x_nchw.shape
    O = weight.shape[0]
    P = H * W

    # Free view (no transpose): NCHW -> (N, C, H*W); pixels land on the lane axis.
    x3 = x_nchw.reshape(N, C, P)

    # Lane-dense pixel tiles: multiple of 128, as large as sensible.
    t_pix = min(_round_up(t_pix_target, 128), _round_up(P, 128))
    P_pad = _round_up(P, t_pix)
    if P_pad != P:
        x3 = jnp.pad(x3, ((0, 0), (0, 0), (0, P_pad - P)))

    use_mxu = (C * O > 128)
    grid = (N, P_pad // t_pix)

    x_spec = pl.BlockSpec((1, C, t_pix), lambda n, p: (n, 0, p))
    o_spec = pl.BlockSpec((1, O, t_pix), lambda n, p: (n, 0, p))

    if use_mxu:
        kernel = _conv1x1_mxu_kernel
        w_arg = weight.reshape(O, C)
        b_arg = bias.reshape(O, 1)
        w_spec = pl.BlockSpec((O, C), lambda n, p: (0, 0))   # resident across grid
        b_spec = pl.BlockSpec((O, 1), lambda n, p: (0, 0))   # resident across grid
    else:
        kernel = _conv1x1_vpu_kernel
        w_arg = weight.reshape(O * C)
        b_arg = bias
        w_spec = pl.BlockSpec(memory_space=pltpu.MemorySpace.SMEM)
        b_spec = pl.BlockSpec(memory_space=pltpu.MemorySpace.SMEM)

    # Explicit VMEM budget: double-buffered x/out tiles + resident params, with
    # headroom; clamped so it is valid on v5e (16 MiB default scoped) and v7x
    # (64 MiB physical).
    itemsize = jnp.dtype(x_nchw.dtype).itemsize
    vmem_needed = 2 * (C + O) * t_pix * itemsize + O * (C + 1) * 4
    vmem_limit = int(min(48 * 2**20, max(8 * 2**20, 4 * vmem_needed)))

    out3 = pl.pallas_call(
        kernel,
        out_shape=jax.ShapeDtypeStruct((N, O, P_pad), x_nchw.dtype),
        grid_spec=pltpu.PrefetchScalarGridSpec(
            num_scalar_prefetch=0,
            grid=grid,
            in_specs=[x_spec, w_spec, b_spec],
            out_specs=o_spec,
        ),
        compiler_params=pltpu.CompilerParams(
            dimension_semantics=("parallel", "parallel"),
            vmem_limit_bytes=vmem_limit,
        ),
    )(x3, w_arg, b_arg)

    # Free view back: (N, O, H*W) -> (N, O, H, W); drop any lane padding.
    return out3[:, :, :P].reshape(N, O, H, W)


if __name__ == "__main__":
    key = jax.random.PRNGKey(0)
    kx, kw, kb = jax.random.split(key, 3)

    N, C_in, H, W = 2, 4, 16, 16
    C_out = 2

    x = jax.random.normal(kx, (N, C_in, H, W), dtype=jnp.float32)
    # Deterministic parameter init (synthetic; mimics Conv2d(C_in, C_out, 1) shapes)
    bound = 1.0 / (C_in ** 0.5)
    weight = jax.random.uniform(kw, (C_out, C_in, 1, 1), jnp.float32, -bound, bound)
    bias = jax.random.uniform(kb, (C_out,), jnp.float32, -bound, bound)

    y = outconv_forward(x, weight, bias)
    jax.block_until_ready(y)

    # Reference check against plain-JAX 1x1 conv semantics
    y_ref = jnp.einsum("nchw,oc->nohw", x, weight.reshape(C_out, C_in)) \
            + bias.reshape(1, C_out, 1, 1)
    assert y.shape == (N, C_out, H, W)
    assert jnp.allclose(y, y_ref, atol=1e-5), "mismatch vs reference"

    print("KERNEL_OK")
</pallas_src>

<mosaic_0001>
module attributes {stable_mosaic.version = 11 : i64} {
  func.func @_conv1x1_vpu_kernel(%arg0: i32, %arg1: i32, %arg2: memref<1x4x256xf32, #tpu.memory_space<vmem>>, %arg3: memref<8xf32, #tpu.memory_space<smem>>, %arg4: memref<2xf32, #tpu.memory_space<smem>>, %arg5: memref<1x2x256xf32, #tpu.memory_space<vmem>>) attributes {dimension_semantics = [#tpu.dimension_semantics<parallel>, #tpu.dimension_semantics<parallel>], iteration_bounds = array<i64: 2, 1>, scalar_prefetch = 0 : i64, scratch_operands = 0 : i64, tpu.core_type = #tpu.core_type<tc>, window_params = [{transform_indices = @transform_0, window_bounds = array<i64: 1, 4, 256>}, {transform_indices = @transform_1, window_bounds = array<i64: 8>}, {transform_indices = @transform_2, window_bounds = array<i64: 2>}, {transform_indices = @transform_3, window_bounds = array<i64: 1, 2, 256>}]} {
    %c0 = arith.constant 0 : index
    %c0_0 = arith.constant 0 : index
    %c0_1 = arith.constant 0 : index
    %0 = vector.load %arg2[%c0, %c0_0, %c0_1] : memref<1x4x256xf32, #tpu.memory_space<vmem>>, vector<1x4x256xf32>
    %1 = vector.shape_cast %0 : vector<1x4x256xf32> to vector<4x256xf32>
    %2 = vector.extract_strided_slice %1 {offsets = [0, 0], sizes = [1, 256], strides = [1, 1]} : vector<4x256xf32> to vector<1x256xf32>
    %c0_2 = arith.constant 0 : index
    %3 = memref.load %arg3[%c0_2] : memref<8xf32, #tpu.memory_space<smem>>
    %4 = vector.broadcast %3 : f32 to vector<1x256xf32>
    %5 = arith.mulf %2, %4 : vector<1x256xf32>
    %6 = vector.extract_strided_slice %1 {offsets = [1, 0], sizes = [1, 256], strides = [1, 1]} : vector<4x256xf32> to vector<1x256xf32>
    %c1 = arith.constant 1 : index
    %7 = memref.load %arg3[%c1] : memref<8xf32, #tpu.memory_space<smem>>
    %8 = vector.broadcast %7 : f32 to vector<1x256xf32>
    %9 = arith.mulf %6, %8 : vector<1x256xf32>
    %10 = arith.addf %5, %9 : vector<1x256xf32>
    %11 = vector.extract_strided_slice %1 {offsets = [2, 0], sizes = [1, 256], strides = [1, 1]} : vector<4x256xf32> to vector<1x256xf32>
    %c2 = arith.constant 2 : index
    %12 = memref.load %arg3[%c2] : memref<8xf32, #tpu.memory_space<smem>>
    %13 = vector.broadcast %12 : f32 to vector<1x256xf32>
    %14 = arith.mulf %11, %13 : vector<1x256xf32>
    %15 = arith.addf %10, %14 : vector<1x256xf32>
    %16 = vector.extract_strided_slice %1 {offsets = [3, 0], sizes = [1, 256], strides = [1, 1]} : vector<4x256xf32> to vector<1x256xf32>
    %c3 = arith.constant 3 : index
    %17 = memref.load %arg3[%c3] : memref<8xf32, #tpu.memory_space<smem>>
    %18 = vector.broadcast %17 : f32 to vector<1x256xf32>
    %19 = arith.mulf %16, %18 : vector<1x256xf32>
    %20 = arith.addf %15, %19 : vector<1x256xf32>
    %c0_3 = arith.constant 0 : index
    %21 = memref.load %arg4[%c0_3] : memref<2xf32, #tpu.memory_space<smem>>
    %22 = vector.broadcast %21 : f32 to vector<1x256xf32>
    %23 = arith.addf %20, %22 : vector<1x256xf32>
    %24 = vector.extract_strided_slice %1 {offsets = [0, 0], sizes = [1, 256], strides = [1, 1]} : vector<4x256xf32> to vector<1x256xf32>
    %c4 = arith.constant 4 : index
    %25 = memref.load %arg3[%c4] : memref<8xf32, #tpu.memory_space<smem>>
    %26 = vector.broadcast %25 : f32 to vector<1x256xf32>
    %27 = arith.mulf %24, %26 : vector<1x256xf32>
    %28 = vector.extract_strided_slice %1 {offsets = [1, 0], sizes = [1, 256], strides = [1, 1]} : vector<4x256xf32> to vector<1x256xf32>
    %c5 = arith.constant 5 : index
    %29 = memref.load %arg3[%c5] : memref<8xf32, #tpu.memory_space<smem>>
    %30 = vector.broadcast %29 : f32 to vector<1x256xf32>
    %31 = arith.mulf %28, %30 : vector<1x256xf32>
    %32 = arith.addf %27, %31 : vector<1x256xf32>
    %33 = vector.extract_strided_slice %1 {offsets = [2, 0], sizes = [1, 256], strides = [1, 1]} : vector<4x256xf32> to vector<1x256xf32>
    %c6 = arith.constant 6 : index
    %34 = memref.load %arg3[%c6] : memref<8xf32, #tpu.memory_space<smem>>
    %35 = vector.broadcast %34 : f32 to vector<1x256xf32>
    %36 = arith.mulf %33, %35 : vector<1x256xf32>
    %37 = arith.addf %32, %36 : vector<1x256xf32>
    %38 = vector.extract_strided_slice %1 {offsets = [3, 0], sizes = [1, 256], strides = [1, 1]} : vector<4x256xf32> to vector<1x256xf32>
    %c7 = arith.constant 7 : index
    %39 = memref.load %arg3[%c7] : memref<8xf32, #tpu.memory_space<smem>>
    %40 = vector.broadcast %39 : f32 to vector<1x256xf32>
    %41 = arith.mulf %38, %40 : vector<1x256xf32>
    %42 = arith.addf %37, %41 : vector<1x256xf32>
    %c1_4 = arith.constant 1 : index
    %43 = memref.load %arg4[%c1_4] : memref<2xf32, #tpu.memory_space<smem>>
    %44 = vector.broadcast %43 : f32 to vector<1x256xf32>
    %45 = arith.addf %42, %44 : vector<1x256xf32>
    %46 = tpu.concatenate %23, %45 in 0 : vector<1x256xf32>, vector<1x256xf32> -> vector<2x256xf32>
    %c0_5 = arith.constant 0 : index
    %c0_6 = arith.constant 0 : index
    %c0_7 = arith.constant 0 : index
    %47 = vector.load %arg5[%c0_5, %c0_6, %c0_7] : memref<1x2x256xf32, #tpu.memory_space<vmem>>, vector<1x2x256xf32>
    %48 = vector.shape_cast %47 : vector<1x2x256xf32> to vector<2x256xf32>
    %49 = vector.shape_cast %46 : vector<2x256xf32> to vector<1x2x256xf32>
    tpu.vector_store %arg5[%c0_5, %c0_6, %c0_7], %49 {strides = array<i32>} : memref<1x2x256xf32, #tpu.memory_space<vmem>>, vector<1x2x256xf32>,
    return
  }
  func.func @transform_0(%arg0: i32, %arg1: i32) -> (i32, i32, i32) {
    %c0_i32 = arith.constant 0 : i32
    %c0_i32_0 = arith.constant 0 : i32
    return %arg0, %c0_i32, %arg1 : i32, i32, i32
  }
  func.func @transform_1(%arg0: i32, %arg1: i32) -> i32 {
    %c0_i32 = arith.constant 0 : i32
    %c0_i32_0 = arith.constant 0 : i32
    return %c0_i32 : i32
  }
  func.func @transform_2(%arg0: i32, %arg1: i32) -> i32 {
    %c0_i32 = arith.constant 0 : i32
    %c0_i32_0 = arith.constant 0 : i32
    return %c0_i32 : i32
  }
  func.func @transform_3(%arg0: i32, %arg1: i32) -> (i32, i32, i32) {
    %c0_i32 = arith.constant 0 : i32
    %c0_i32_0 = arith.constant 0 : i32
    return %arg0, %c0_i32, %arg1 : i32, i32, i32
  }
}

</mosaic_0001>

<bundles_post_ra>
// kernel: tpu_custom_call.1
= control target key start
LH: loop header
LB: loop body
LE: loop exit
PB: predicated region body
PF: predicated region fallthrough
CT: control target
= control target key end

     0   :  { %8 = vsyncpa [#allocation3], 0  ;;  %s964_s0 = inlined_call_operand.hbm [shape: f32[2,4,256], index: 0, kind: input, shape index: {}]   ;;  %s965_s1 = inlined_call_operand.vmem [shape: f32[8], index: 1, kind: input, shape index: {}]   ;;  %s966_s2 = inlined_call_operand.vmem [shape: f32[2], index: 2, kind: input, shape index: {}]   ;;  %s967_s3 = inlined_call_operand.hbm [shape: f32[2,2,256], index: 3, kind: output, shape index: {}]  }
   0x1   :  { %10 = vsyncpa [#allocation3 + $0x1], 0 }
   0x2   :  { %11 = vsyncpa [#allocation5], 0 }
   0x3   :  { %12 = vsyncpa [#allocation8], 0 }
   0x4   :  { %13 = vsyncpa [#allocation4], 0 }
   0x5   :  { %15 = vsyncpa [#allocation4 + $0x1], 0  ;;  %s750_s12 = smov 0   ;;  %s752_s13 = smov 0  }
   0x6   :  { %s754_s14 = smov 0   ;;  %s756_s15 = smov 0  }
   0x7   :  { %s758_s16 = smov 0   ;;  %s760_s17 = smov 0  }
   0x8 LB: > { %s455_s18 = sadd.s32 4294967295, %s724_s17   ;;  %s456_s19 = sadd.s32 4294967294, %s724_s17   ;;  %s724_s17 = sphi %s760_s17, %s21_s17   ;;  %s720_s16 = sphi %s758_s16, %s990_s16   ;;  %s716_s15 = sphi %s756_s15, %s989_s15   ;;  %s712_s14 = sphi %s754_s14, %s988_s14   ;;  %s708_s13 = sphi %s752_s13, %s987_s13   ;;  %s704_s12 = sphi %s750_s12, %s986_s12  }
   0x9   : > { %p55_p0 = scmp.ne.s32.totalorder %s708_s13, %s704_s12  ;;  %p784_p1 = scmp.eq.s32.totalorder %s455_s18, 0 }
   0xa   : > { %p788_p2 = scmp.eq.s32.totalorder %s455_s18, 1  ;;  %p129_p3 = scmp.eq.s32.totalorder %s456_s19, 1 }
   0xb   : > { %s972_s20 = scalar_select %p784_p1, 1, 0 }
   0xc   : > { %s973_s21 = scalar_select %p788_p2, 1, 0 }
   0xd   : > { %p794_p4 = por %p784_p1, %p55_p0  ;;  %p457_p5 = scmp.ge.s32.totalorder %s724_s17, 1 }
   0xe   : > { %p799_p6 = por %p129_p3, %p55_p0  ;;  %p136_p7 = scmp.lt.s32.totalorder %s724_s17, 3 }
   0xf   : > { %s974_s22 = scalar_select %p794_p4, 1, 0 }
  0x10   : > { %s975_s23 = scalar_select %p799_p6, 1, 0 }
  0x11   : > { %s149_s26 = sshll.u32 %s965_s1, 4  ;;  %p807_p8 = pnand %p457_p5, %p136_p7  ;;  %s150_s26 = int_to_ptr.vmem [resolvable:$true] %s149_s26 }
  0x12   : > { %s160_s30 = sshll.u32 %s966_s2, 4  ;;  %s574_s5 = scalar_lea.vmem %s150_s26, 16  ;;  %s161_s30 = int_to_ptr.vmem [resolvable:$true] %s160_s30 }
  0x13   : > { %s976_s27 = scalar_select %p807_p8, 1, 0 }
  0x14   : > { %p503_p10 = pneg %p807_p8  ;;  %p575_p12 = scmp.ne.s32.totalorder %s150_s26, %s574_s5 }
  0x15   : > { %p582_p5 = scmp.lt.s32.totalorder %s150_s26, %s150_s26  ;;  %p583_p7 = scmp.lt.s32.totalorder %s574_s5, %s574_s5 }
  0x16   : > { %p819_p11 = pnand %p503_p10, %p784_p1 }
  0x17   : > { %p584_p9 = por %p583_p7, %p582_p5 }
  0x18   : > { %p576_p13 = pneg %p819_p11 }
  0x1a   : > { %p577_p0 = pnand %p576_p13, %p575_p12 }
  0x1c   : > { %p578_p3 = pneg %p577_p0 }
  0x1e   : > { %p585_p6 = pnand %p584_p9, %p578_p3 }
  0x20   : > { %588 = shalt.err (!%p585_p6)
}
  0x21   : > { %s726_s6 = smov [#allocation6]   ;;  %s589_s7 = scalar_lea.vmem %s161_s30, 16 }
  0x22   : > { %506 = dma.vmem_to_smem (!%p819_p11), %s150_s26, 16, %s726_s6, [#allocation5]  }
  0x23   : > { %p590_p10 = scmp.ne.s32.totalorder %s161_s30, %s589_s7  ;;  %p597_p8 = scmp.lt.s32.totalorder %s161_s30, %s161_s30 }
  0x24   : > { %p598_p2 = scmp.lt.s32.totalorder %s589_s7, %s589_s7 }
  0x25   : > { %p592_p1 = pnand %p590_p10, %p576_p13 }
  0x26   : > { %p599_p12 = por %p598_p2, %p597_p8 }
  0x27   : > { %p593_p4 = pneg %p592_p1 }
  0x29   : > { %p600_p0 = pnand %p599_p12, %p593_p4 }
  0x2b   : > { %603 = shalt.err (!%p600_p0)
}
  0x2c   : > { %s727_s8 = smov [#allocation7]   ;;  %s33_s9 = sadd.s32 1, %s720_s16 }
  0x2d   : > { %509 = dma.vmem_to_smem (!%p819_p11), %s161_s30, 16, %s727_s8, [#allocation8]  }
  0x2e   : > { %s42_s10 = sadd.s32 1, %s712_s14  ;;  %p35_p1 = scmp.ge.s32.totalorder %s33_s9, 2 }
  0x2f   : > { %p49_p2 = scmp.ne.s32.totalorder %s712_s14, %s708_s13  ;;  %p50_p4 = scmp.eq.s32.totalorder %s724_s17, 0 }
  0x30   : > { %p520_p6 = scmp.lt.s32.totalorder %s724_s17, 2  ;;  %s992_s9 = smov (%p35_p1, %s33_s9), 0 }
  0x31   : > { %p51_p8 = por %p50_p4, %p49_p2  ;;  %p978_p9 = scmp.ne.s32.totalorder %s973_s21, 0 }
  0x32   : > { %s37_s18 = ssub.s32 %s720_s16, %s992_s9  ;;  %s171_s19 = sand.u32 1, %s712_s14  }
  0x33   : > { %p839_p13 = por %p978_p9, %p49_p2  ;;  %p40_p3 = scmp.eq.s32.totalorder %s37_s18, 0 }
  0x34   : > { %s461_s24 = sshll.u32 %s171_s19, 3  ;;  %s489_s25 = sshll.u32 %s720_s16, 7 }
  0x35   : > { %s848_s26 = scalar_select %p40_p3, %s712_s14, %s42_s10  }
  0x36   : > { %s853_s30 = scalar_lea.hbm %s964_s0, %s489_s25  ;;  %s175_s21 = scalar_lea.vmem [#allocation2], %s461_s24 }
  0x37   : > { %s185_s4 = sshll.u32 %s175_s21, 4  ;;  %p857_p11 = pnand %p520_p6, %p51_p8  ;;  %s861_s4 = int_to_ptr.vmem [resolvable:$true] %s185_s4 }
  0x38   : > { %s172_s6 = scalar_lea.sflag [#allocation3], %s171_s19  ;;  %s604_s7 = scalar_lea.hbm %s853_s30, 128 }
  0x39   : > { %p605_p5 = scmp.ne.s32.totalorder %s853_s30, %s604_s7  ;;  %p606_p7 = pneg %p857_p11 }
  0x3a   : > { %s609_s18 = scalar_lea.hbm %s964_s0, 256  ;;  %p610_p0 = scmp.lt.u32.totalorder %s853_s30, %s964_s0 }
  0x3b   : > { %p607_p10 = pnand %p606_p7, %p605_p5  ;;  %p611_p1 = scmp.lt.u32.totalorder %s609_s18, %s604_s7 }
  0x3c   : > { %p613_p4 = scmp.lt.u32.totalorder %s604_s7, %s853_s30 }
  0x3d   : > { %p608_p12 = pneg %p607_p10  ;;  %p612_p2 = por %p611_p1, %p610_p0 }
  0x3f   : > { %p614_p6 = por %p613_p4, %p612_p2 }
  0x41   : > { %p615_p8 = pnand %p614_p6, %p608_p12 }
  0x43   : > { %618 = shalt.err (!%p615_p8)
}
  0x44   : > { %s619_s19 = scalar_lea.vmem %s861_s4, 128  ;;  %s728_s28 = smov [#allocation2]  }
  0x45   : > { %p620_p9 = scmp.ne.s32.totalorder %s861_s4, %s619_s19  ;;  %s624_s29 = sshll.u32 %s728_s28, 4  ;;  %s625_s29 = int_to_ptr.vmem [resolvable:$false] %s624_s29 }
  0x46   : > { %s626_s21 = scalar_lea.vmem %s625_s29, 256  ;;  %p627_p10 = scmp.lt.s32.totalorder %s861_s4, %s625_s29 }
  0x47   : > { %p622_p3 = pnand %p620_p9, %p606_p7  ;;  %p628_p0 = scmp.lt.s32.totalorder %s626_s21, %s619_s19 }
  0x49   : > { %p623_p5 = pneg %p622_p3  ;;  %p629_p1 = por %p628_p0, %p627_p10 }
  0x4b   : > { %p630_p2 = pnand %p629_p1, %p623_p5 }
  0x4d   : > { %633 = shalt.err (!%p630_p2)
}
  0x4e   : > { %513 = dma.hbm_to_vmem [thread:$0]  (!%p857_p11), %s853_s30, 128, %s861_s4, %s172_s6  }
  0x4f   : > { %p981_p12 = scmp.ne.s32.totalorder %s976_s27, 0 }
  0x50   : > { %s891_s7 = sand.u32 (!%p981_p12), 1, %s708_s13   ;;  %p982_p7 = scmp.ne.s32.totalorder (!%p981_p12), %s974_s22, 0 }
  0x51   : > { %194 = sbr.rel (%p981_p12) target bundleno = 136 (0x88), region = 32  ;;  %s465_s8 = sshll.u32 (!%p981_p12), %s891_s7, 3 }
  0x52   : > { %s197_s10 = scalar_lea.sflag (!%p981_p12), [#allocation3], %s891_s7  ;;  %s200_s18 = scalar_lea.vmem (!%p981_p12), [#allocation2], %s465_s8 }
  0x58   : > { %687 = dma.done.wait (%p982_p7), %s197_s10, 128  }
  0x59   : > { %689 = vsyncadd (%p982_p7), %s197_s10, 4294967168  ;;  %p983_p4 = scmp.ne.s32.totalorder %s972_s20, 0 }
  0x5b   : > { %691 = dma.done.wait (%p983_p4), [#allocation5], 16  }
  0x5c   : > { %693 = vsyncadd (%p983_p4), [#allocation5], 4294967280 }
  0x5d   : > { %695 = dma.done.wait (%p983_p4), [#allocation8], 16  }
  0x5e   : > { %697 = vsyncadd (%p983_p4), [#allocation8], 4294967280 }
  0x5f   : > { %213 = sfence }
  0x60   : > { %s235_s27 = sld [smem:[#allocation6]]  ;;  %s469_s30 = sld [smem:[#allocation6 + $0x1]]  ;;  %v234_v0 = vld [vmem:[%s200_s18] sm:$0xff]  ;;  %v296_v10 = vlaneseq  ;;  %vm317_vm0 = vcmask 1040384  }
  0x61   : > { %s471_s4 = sld [smem:[#allocation6 + $0x2]]  ;;  %s473_s5 = sld [smem:[#allocation6 + $0x3]] }
  0x62   : > { %s475_s6 = sld [smem:[#allocation6 + $0x4]]  ;;  %s476_s22 = sld [smem:[#allocation6 + $0x5]]  ;;  %v297_v24 = vshrl.u32 %v296_v10, 7 }
  0x63   : > { %s478_s24 = sld [smem:[#allocation6 + $0x6]]  ;;  %s480_s25 = sld [smem:[#allocation6 + $0x7]] }
  0x64   : > { %s907_s19 = sld [smem:[#allocation7]]  ;;  %s482_s20 = sld [smem:[#allocation7 + $0x1]]  ;;  %v298_v31 = vsub.s32 0, %v297_v24  ;;  %v302_v32 = vsub.s32 4, %v297_v24 }
  0x65   : > { %s468_s28 = sshll.u32 %s891_s7, 2  ;;  %s490_s8 = sshll.u32 %s716_s15, 6 }
  0x66   : > { %v236_v1 = vstv %s235_s27  ;;  %v239_v2 = vstv %s469_s30  ;;  %s231_s29 = scalar_lea.vmem [#allocation9], %s468_s28  ;;  %s917_s27 = scalar_lea.hbm %s967_s3, %s490_s8 }
  0x67   : > { %v237_v3 = vmul.f32 %v236_v1, %v234_v0  ;;  %v240_v4 = vmul.f32 %v239_v2, %v234_v0  ;;  %v247_v5 = vstv %s471_s4  ;;  %v255_v6 = vstv %s473_s5  ;;  %s349_s21 = sshll.u32 %s231_s29, 4  ;;  %s333_s30 = scalar_lea.sflag [#allocation4], %s891_s7  ;;  %s912_s21 = int_to_ptr.vmem [resolvable:$true] %s349_s21 }
  0x68   : > { %v248_v7 = vmul.f32 %v247_v5, %v234_v0  ;;  %v256_v8 = vmul.f32 %v255_v6, %v234_v0  ;;  %v266_v9 = vstv %s475_s6  ;;  %v269_v12 = vstv %s476_s22  ;;  %s634_s4 = scalar_lea.vmem %s912_s21, 64  ;;  %s729_s15 = smov [#allocation9]  }
  0x69   : > { %v470_v11 = vrot.slane %v240_v4, 9  ;;  %v277_v13 = vstv %s478_s24  ;;  %v267_v15 = vmul.f32 %v266_v9, %v234_v0  ;;  %v270_v16 = vmul.f32 %v269_v12, %v234_v0  ;;  %p635_p11 = scmp.ne.s32.totalorder %s912_s21, %s634_s4  ;;  %s638_s5 = sshll.u32 %s729_s15, 4  ;;  %s639_s5 = int_to_ptr.vmem [resolvable:$false] %s638_s5 }
  0x6a   : > { %v472_v14 = vrot.slane %v248_v7, 10  ;;  %v278_v17 = vmul.f32 %v277_v13, %v234_v0  ;;  %v474_v19 = vrot.slane %v256_v8, 11  ;;  %v285_v20 = vstv %s480_s25  ;;  %s640_s6 = scalar_lea.vmem %s639_s5, 128  ;;  %p641_p9 = scmp.lt.s32.totalorder %s912_s21, %s639_s5 }
  0x6b   : > { %v245_v18 = vadd.f32 %v470_v11, %v237_v3  ;;  %v477_v21 = vrot.slane %v270_v16, 9  ;;  %v286_v23 = vmul.f32 %v285_v20, %v234_v0  ;;  %v263_v26 = vstv %s907_s19  ;;  %p636_p6 = pnand %p635_p11, %p839_p13  ;;  %p642_p3 = scmp.lt.s32.totalorder %s640_s6, %s634_s4 }
  0x6c   : > { %v479_v22 = vrot.slane %v278_v17, 10  ;;  %v293_v34 = vstv %s482_s20 }
  0x6d   : > { %v253_v25 = vadd.f32 %v472_v14, %v245_v18  ;;  %v275_v27 = vadd.f32 %v477_v21, %v267_v15  ;;  %v481_v28 = vrot.slane %v286_v23, 11  ;;  %p637_p8 = pneg %p636_p6  ;;  %p643_p5 = por %p642_p3, %p641_p9 }
  0x6f   : > { %v261_v29 = vadd.f32 %v474_v19, %v253_v25  ;;  %v283_v30 = vadd.f32 %v479_v22, %v275_v27  ;;  %p644_p10 = pnand %p643_p5, %p637_p8 }
  0x71   : > { %v264_v33 = vadd.f32 %v263_v26, %v261_v29  ;;  %v291_v35 = vadd.f32 %v481_v28, %v283_v30 }
  0x73   : > { %v294_v36 = vadd.f32 %v293_v34, %v291_v35  ;;  %v299_v37 = vrot.slane %v264_v33, %v298_v31  ;;  %v303_v38 = vrot.slane %v264_v33, %v302_v32 }
  0x75   : > { %v310_v39 = vrot.slane %v294_v36, %v298_v31  ;;  %v314_v40 = vrot.slane %v294_v36, %v302_v32 }
  0x77   : > { %v318_v41 = vsel %vm317_vm0, %v299_v37, %v310_v39  ;;  %v319_v42 = vsel %vm317_vm0, %v303_v38, %v314_v40 }
  0x78   : > { %v322_v43 = vcombine.low %v318_v41, %v319_v42 }
  0x7a   : > { %483 = vst.sshfl [vmem:[%s231_s29] sm:$0x33 pattern:$0x76325410] %v322_v43 }
  0x7b   : > { %647 = shalt.err (!%p644_p10)
}
  0x7c   : > { %s648_s7 = scalar_lea.hbm %s917_s27, 64  ;;  %s652_s25 = scalar_lea.hbm %s967_s3, 128 }
  0x7d   : > { %p649_p0 = scmp.ne.s32.totalorder %s917_s27, %s648_s7  ;;  %p653_p12 = scmp.lt.u32.totalorder %s917_s27, %s967_s3 }
  0x7e   : > { %p654_p7 = scmp.lt.u32.totalorder %s652_s25, %s648_s7  ;;  %p656_p11 = scmp.lt.u32.totalorder %s648_s7, %s917_s27 }
  0x7f   : > { %p650_p1 = pnand %p649_p0, %p839_p13 }
  0x80   : > { %p655_p4 = por %p654_p7, %p653_p12 }
  0x81   : > { %p651_p2 = pneg %p650_p1 }
  0x82   : > { %p657_p6 = por %p656_p11, %p655_p4 }
  0x84   : > { %p658_p8 = pnand %p657_p6, %p651_p2 }
  0x86   : > { %661 = shalt.err (!%p658_p8)
}
  0x87   : > { %501 = dma.vmem_to_hbm [thread:$0]  (%p839_p13), %s912_s21, 64, %s917_s27, %s333_s30  }
  0x88 PF: > { %s361_s28 = sand.u32 1, %s704_s12   ;;  %p984_p9 = scmp.ne.s32.totalorder %s975_s23, 0 }
  0x89   : > { %p985_p3 = scmp.ge.s32.totalorder %s724_s17, 2  ;;  %s362_s29 = scalar_lea.sflag [#allocation4], %s361_s28 }
  0x8b   : > { %p515_p5 = pnand %p985_p3, %p984_p9 }
  0x8d   : > { %699 = dma.done.wait (!%p515_p5), %s362_s29, 64  }
  0x8e   : > { %701 = vsyncadd (!%p515_p5), %s362_s29, 4294967232  ;;  %s21_s17 = sadd.s32 1, %s724_s17   ;;  %s986_s12 = smov %s708_s13 }
  0x8f   : > { %p18_p10 = scmp.ge.s32.totalorder %s21_s17, 4   ;;  %s987_s13 = smov %s712_s14 }
  0x90   : > { %s988_s14 = smov %s848_s26  ;;  %s989_s15 = smov %s720_s16 }
  0x91   : > { %s990_s16 = smov %s992_s9  ;;  %20 = sbr.rel (!%p18_p10) target bundleno = 8 (0x8), region = 86 }
  0x98   :  { %367 = vsyncpa [#allocation3], 1 }
  0x99   :  { %369 = vsyncpa [#allocation3 + $0x1], 1 }
  0x9a   :  { %370 = vsyncpa [#allocation4], 1 }
  0x9b   :  { %372 = vsyncpa [#allocation4 + $0x1], 1 }
  0x9c   :  { %373 = vsyncpa [#allocation5], 1 }
  0x9d   :  { %375 = vsyncpa [#allocation5 + $0x1], 1 }
  0x9e   :  { %376 = vsyncpa [#allocation8], 1 }

</bundles_post_ra>
